<compile_context>
chip_gen: v5e
topology: v5e:2x2
jax: 0.10.0
libtpu: 0.0.40
codegen_flags: <defaults>
</compile_context>

<pallas_src>
import functools
import math

import jax
import jax.numpy as jnp
from jax import lax
from jax.experimental import pallas as pl
from jax.experimental.pallas import tpu as pltpu


def _round_up(x: int, m: int) -> int:
    return -(-x // m) * m


def _per_lane_const(lane4, vals):
    """(TR, C) f32 array holding vals[lane % 4] in every lane."""
    v0, v1, v2, v3 = (float(v) for v in vals)
    return jnp.where(lane4 == 0, v0,
           jnp.where(lane4 == 1, v1,
           jnp.where(lane4 == 2, v2, v3)))


def _decoder_kernel(boxes_ref, delta_ref, out_ref, *,
                    legacy_bbox: bool, reg_mean, reg_std):
    # Interleaved layout: every 4 consecutive lanes hold one box
    # (x1, y1, x2, y2) and one delta (dx, dy, dw, dh). lane_cols % 4 == 0, so
    # a box never straddles a row and the wrapped values of the lane rolls
    # below are never selected.
    b = boxes_ref[...].astype(jnp.float32)        # (TR, C)
    d = delta_ref[...].astype(jnp.float32)        # (TR, C)
    tr, c = b.shape

    lane4 = lax.broadcasted_iota(jnp.int32, (tr, c), 1) % 4
    is_lo = lane4 < 2      # lanes holding x1/y1 (and producing px1/py1)

    # De-normalize deltas with compile-time per-lane constants (module buffers).
    mean = tuple(float(v) for v in reg_mean)
    std = tuple(float(v) for v in reg_std)
    if std != (1.0, 1.0, 1.0, 1.0) or mean != (0.0, 0.0, 0.0, 0.0):
        d = d * _per_lane_const(lane4, std) + _per_lane_const(lane4, mean)

    # Pair each lane with its partner coordinate 2 lanes away (lane i <-> i^2).
    # pltpu.roll follows jnp.roll semantics: roll(x, s)[i] = x[(i - s) mod c];
    # shifts are static and positive (c - 2 == "2 lanes ahead").
    b_ahead  = pltpu.roll(b, c - 2, 1)   # x2/y2 as seen from the x1/y1 lanes
    b_behind = pltpu.roll(b, 2, 1)       # x1/y1 as seen from the x2/y2 lanes
    d_ahead  = pltpu.roll(d, c - 2, 1)   # dw/dh as seen from the dx/dy lanes
    d_behind = pltpu.roll(d, 2, 1)       # dx/dy as seen from the dw/dh lanes

    lo  = jnp.where(is_lo, b, b_behind)        # x1 / y1 for this lane's axis
    hi  = jnp.where(is_lo, b_ahead, b)         # x2 / y2
    d_t = jnp.where(is_lo, d, d_behind)        # dx / dy
    d_s = jnp.where(is_lo, d_ahead, d)         # dw / dh

    off = 1.0 if legacy_bbox else 0.0
    size = hi - lo + off                       # w on x lanes, h on y lanes
    ctr = lo + (size - off) * 0.5              # cx / cy
    p_ctr = d_t * size + ctr
    # Unclamped exp matches the reference module (no bbox_xform_clip); EUP slot
    # has huge slack so no approximation is needed.
    p_size = jnp.exp(d_s) * size
    half = (p_size - off) * 0.5
    # px1 = pcx - (pw-off)/2 ; px2 = px1 + pw - off == pcx + (pw-off)/2
    out = jnp.where(is_lo, p_ctr - half, p_ctr + half)
    out_ref[...] = out.astype(out_ref.dtype)


def xywh_bbox_decode(boxes, boxes_delta, reg_mean, reg_std, *,
                     legacy_bbox: bool = False, row_block: int = 1024):
    """Pallas-TPU port of XYWHBBoxDecoder.forward.

    boxes, boxes_delta: (..., 4) arrays (f32 or bf16). Returns decoded corner
    boxes with the same shape and the promoted input dtype.
    """
    assert boxes.shape == boxes_delta.shape and boxes.shape[-1] == 4
    assert len(reg_mean) == 4 and len(reg_std) == 4
    orig_shape = boxes.shape

    f32 = jnp.dtype(jnp.float32)
    bf16 = jnp.dtype(jnp.bfloat16)

    def _prep(x):  # DMA bf16/f32 natively; anything else -> f32
        return x if x.dtype in (f32, bf16) else x.astype(jnp.float32)

    boxes = _prep(boxes)
    boxes_delta = _prep(boxes_delta)
    out_dtype = jnp.promote_types(boxes.dtype, boxes_delta.dtype)

    n = math.prod(orig_shape[:-1])
    flat_len = 4 * n

    # Native interleaved layout: flat reshape is free (no transpose pass).
    bflat = boxes.reshape((flat_len,))
    dflat = boxes_delta.reshape((flat_len,))

    # Lane width: multiple of 128 (unmasked stores); shrink for small inputs so
    # the minimum 8-row footprint does not dwarf the real data.
    lane_cols = 128 if n < 4096 else 512

    r = -(-flat_len // lane_cols)
    padded_len = r * lane_cols
    padded = padded_len != flat_len
    if padded:
        # TODO(synk): this tail pad costs one extra HBM pass per input; callers
        # with (4 * num_boxes) % lane_cols == 0 hit the zero-copy path.
        bflat = jnp.pad(bflat, (0, padded_len - flat_len))
        dflat = jnp.pad(dflat, (0, padded_len - flat_len))
    b2 = bflat.reshape(r, lane_cols)
    d2 = dflat.reshape(r, lane_cols)

    # Row tiling: blocks of `tr` rows (multiple of the sublane granule, up to
    # row_block); force >= 2 grid steps whenever possible so v7x can shard the
    # "parallel" axis over both TensorCores. Partial last block is fine
    # (masked writes / clipped DMA).
    sub = 16 if bf16 in (boxes.dtype, boxes_delta.dtype, out_dtype) else 8
    if r <= sub:
        tr = r                                    # single full-extent block
    else:
        tr = min(_round_up(row_block, sub), _round_up(-(-r // 2), sub))
    grid = (-(-r // tr),)

    elt = max(jnp.dtype(boxes.dtype).itemsize,
              jnp.dtype(boxes_delta.dtype).itemsize,
              jnp.dtype(out_dtype).itemsize)
    block_bytes = tr * lane_cols * elt
    vmem_need = 3 * 2 * block_bytes               # 3 operands, double-buffered
    vmem_limit = int(min(48 << 20,
                         max(16 << 20, vmem_need + vmem_need // 2 + (2 << 20))))

    kernel = functools.partial(
        _decoder_kernel,
        legacy_bbox=bool(legacy_bbox),
        reg_mean=tuple(float(v) for v in reg_mean),
        reg_std=tuple(float(v) for v in reg_std),
    )

    out = pl.pallas_call(
        kernel,
        out_shape=jax.ShapeDtypeStruct((r, lane_cols), out_dtype),
        grid=grid,
        in_specs=[
            pl.BlockSpec((tr, lane_cols), lambda i: (i, 0)),   # boxes
            pl.BlockSpec((tr, lane_cols), lambda i: (i, 0)),   # deltas
        ],
        out_specs=pl.BlockSpec((tr, lane_cols), lambda i: (i, 0)),
        compiler_params=pltpu.CompilerParams(
            dimension_semantics=("parallel",),
            vmem_limit_bytes=vmem_limit,
        ),
    )(b2, d2)

    flat_out = out.reshape((padded_len,))
    if padded:
        flat_out = flat_out[:flat_len]
    return flat_out.reshape(orig_shape)


def _reference_decode(boxes, boxes_delta, reg_mean, reg_std, legacy_bbox=False):
    """Pure-jnp reference mirroring the PyTorch module."""
    off = 1.0 if legacy_bbox else 0.0
    x1, y1, x2, y2 = jnp.split(boxes.astype(jnp.float32), 4, axis=-1)
    w = x2 - x1 + off
    h = y2 - y1 + off
    cx = x1 + (w - off) * 0.5
    cy = y1 + (h - off) * 0.5
    d = (boxes_delta.astype(jnp.float32) * jnp.asarray(reg_std, jnp.float32)
         + jnp.asarray(reg_mean, jnp.float32))
    dx, dy, dw, dh = jnp.split(d, 4, axis=-1)
    pcx = dx * w + cx
    pcy = dy * h + cy
    pw = jnp.exp(dw) * w
    ph = jnp.exp(dh) * h
    px1 = pcx - (pw - off) * 0.5
    py1 = pcy - (ph - off) * 0.5
    px2 = px1 + pw - off
    py2 = py1 + ph - off
    return jnp.concatenate([px1, py1, px2, py2], axis=-1)


if __name__ == "__main__":
    # Deterministic "buffers" from the module __init__ (synthetic, non-trivial).
    reg_mean = (0.1, -0.1, 0.05, -0.05)
    reg_std = (1.0, 1.1, 0.9, 1.2)

    key = jax.random.PRNGKey(0)

    ok = True
    # Shapes: small primary case, a zero-copy multi-block case, and a case that
    # exercises the tail-pad + partial-last-block path.
    for batch, num_boxes in ((2, 8), (2, 2048), (1, 4128)):
        k1, k2, k3 = jax.random.split(jax.random.fold_in(key, num_boxes), 3)
        xy = jax.random.uniform(k1, (batch, num_boxes, 2), jnp.float32, 0.0, 50.0)
        wh = jax.random.uniform(k2, (batch, num_boxes, 2), jnp.float32, 1.0, 20.0)
        boxes = jnp.concatenate([xy, xy + wh], axis=-1)          # valid corners
        deltas = jax.random.normal(k3, (batch, num_boxes, 4), jnp.float32) * 0.2

        for legacy in (False, True):
            out = xywh_bbox_decode(boxes, deltas, reg_mean, reg_std,
                                   legacy_bbox=legacy)
            out = jax.block_until_ready(out)
            ref = _reference_decode(boxes, deltas, reg_mean, reg_std, legacy)
            ok &= out.shape == boxes.shape and out.dtype == boxes.dtype
            ok &= bool(jnp.allclose(out, ref, atol=1e-3, rtol=1e-4))

    assert ok, "mismatch vs reference"
    print("KERNEL_OK")
</pallas_src>

<mosaic_0001>
module attributes {stable_mosaic.version = 11 : i64} {
  func.func @_decoder_kernel(%arg0: i32, %arg1: memref<1x128xf32, #tpu.memory_space<vmem>>, %arg2: memref<1x128xf32, #tpu.memory_space<vmem>>, %arg3: memref<1x128xf32, #tpu.memory_space<vmem>>) attributes {dimension_semantics = [#tpu.dimension_semantics<parallel>], iteration_bounds = array<i64: 1>, scalar_prefetch = 0 : i64, scratch_operands = 0 : i64, tpu.core_type = #tpu.core_type<tc>, window_params = [{transform_indices = @transform_0, window_bounds = array<i64: 1, 128>}, {transform_indices = @transform_1, window_bounds = array<i64: 1, 128>}, {transform_indices = @transform_2, window_bounds = array<i64: 1, 128>}]} {
    %c0 = arith.constant 0 : index
    %c0_0 = arith.constant 0 : index
    %0 = vector.load %arg1[%c0, %c0_0] : memref<1x128xf32, #tpu.memory_space<vmem>>, vector<1x128xf32>
    %c0_1 = arith.constant 0 : index
    %c0_2 = arith.constant 0 : index
    %1 = vector.load %arg2[%c0_1, %c0_2] : memref<1x128xf32, #tpu.memory_space<vmem>>, vector<1x128xf32>
    %2 = tpu.iota {dimensions = array<i32: 1>} : vector<1x128xi32>
    %c4_i32 = arith.constant 4 : i32
    %c0_i32 = arith.constant 0 : i32
    %3 = arith.cmpi eq, %c4_i32, %c0_i32 : i32
    %c1_i32 = arith.constant 1 : i32
    %4 = arith.select %3, %c1_i32, %c4_i32 : i32
    %5 = vector.broadcast %4 : i32 to vector<1x128xi32>
    %6 = arith.remsi %2, %5 : vector<1x128xi32>
    %c0_i32_3 = arith.constant 0 : i32
    %7 = vector.broadcast %c0_i32_3 : i32 to vector<1x128xi32>
    %8 = arith.cmpi ne, %6, %7 : vector<1x128xi32>
    %c0_i32_4 = arith.constant 0 : i32
    %9 = vector.broadcast %c0_i32_4 : i32 to vector<1x128xi32>
    %10 = arith.cmpi slt, %6, %9 : vector<1x128xi32>
    %c0_i32_5 = arith.constant 0 : i32
    %11 = arith.cmpi slt, %4, %c0_i32_5 : i32
    %12 = vector.broadcast %11 : i1 to vector<1x128xi1>
    %13 = vector.broadcast %12 : vector<1x128xi1> to vector<1x128xi1>
    %14 = arith.xori %10, %13 : vector<1x128xi1>
    %15 = arith.andi %14, %8 : vector<1x128xi1>
    %16 = vector.broadcast %4 : i32 to vector<1x128xi32>
    %17 = arith.addi %6, %16 : vector<1x128xi32>
    %18 = arith.select %15, %17, %6 : vector<1x128xi1>, vector<1x128xi32>
    %c2_i32 = arith.constant 2 : i32
    %19 = vector.broadcast %c2_i32 : i32 to vector<1x128xi32>
    %20 = arith.cmpi slt, %18, %19 : vector<1x128xi32>
    %c0_i32_6 = arith.constant 0 : i32
    %21 = vector.broadcast %c0_i32_6 : i32 to vector<1x128xi32>
    %22 = arith.cmpi eq, %18, %21 : vector<1x128xi32>
    %c1_i32_7 = arith.constant 1 : i32
    %23 = vector.broadcast %c1_i32_7 : i32 to vector<1x128xi32>
    %24 = arith.cmpi eq, %18, %23 : vector<1x128xi32>
    %c2_i32_8 = arith.constant 2 : i32
    %25 = vector.broadcast %c2_i32_8 : i32 to vector<1x128xi32>
    %26 = arith.cmpi eq, %18, %25 : vector<1x128xi32>
    %cst = arith.constant 0.899999976 : f32
    %cst_9 = arith.constant 1.200000e+00 : f32
    %27 = vector.broadcast %cst : f32 to vector<1x128xf32>
    %28 = vector.broadcast %cst_9 : f32 to vector<1x128xf32>
    %29 = arith.select %26, %27, %28 : vector<1x128xi1>, vector<1x128xf32>
    %cst_10 = arith.constant 1.100000e+00 : f32
    %30 = vector.broadcast %cst_10 : f32 to vector<1x128xf32>
    %31 = arith.select %24, %30, %29 : vector<1x128xi1>, vector<1x128xf32>
    %cst_11 = arith.constant 1.000000e+00 : f32
    %32 = vector.broadcast %cst_11 : f32 to vector<1x128xf32>
    %33 = arith.select %22, %32, %31 : vector<1x128xi1>, vector<1x128xf32>
    %34 = arith.mulf %1, %33 : vector<1x128xf32>
    %c0_i32_12 = arith.constant 0 : i32
    %35 = vector.broadcast %c0_i32_12 : i32 to vector<1x128xi32>
    %36 = arith.cmpi eq, %18, %35 : vector<1x128xi32>
    %c1_i32_13 = arith.constant 1 : i32
    %37 = vector.broadcast %c1_i32_13 : i32 to vector<1x128xi32>
    %38 = arith.cmpi eq, %18, %37 : vector<1x128xi32>
    %c2_i32_14 = arith.constant 2 : i32
    %39 = vector.broadcast %c2_i32_14 : i32 to vector<1x128xi32>
    %40 = arith.cmpi eq, %18, %39 : vector<1x128xi32>
    %cst_15 = arith.constant 5.000000e-02 : f32
    %cst_16 = arith.constant -5.000000e-02 : f32
    %41 = vector.broadcast %cst_15 : f32 to vector<1x128xf32>
    %42 = vector.broadcast %cst_16 : f32 to vector<1x128xf32>
    %43 = arith.select %40, %41, %42 : vector<1x128xi1>, vector<1x128xf32>
    %cst_17 = arith.constant -1.000000e-01 : f32
    %44 = vector.broadcast %cst_17 : f32 to vector<1x128xf32>
    %45 = arith.select %38, %44, %43 : vector<1x128xi1>, vector<1x128xf32>
    %cst_18 = arith.constant 1.000000e-01 : f32
    %46 = vector.broadcast %cst_18 : f32 to vector<1x128xf32>
    %47 = arith.select %36, %46, %45 : vector<1x128xi1>, vector<1x128xf32>
    %48 = arith.addf %34, %47 : vector<1x128xf32>
    %c126_i32 = arith.constant 126 : i32
    %49 = tpu.dynamic_rotate %0 by %c126_i32 dim 1 : vector<1x128xf32>, i32 -> vector<1x128xf32>
    %c2_i32_19 = arith.constant 2 : i32
    %50 = tpu.dynamic_rotate %0 by %c2_i32_19 dim 1 : vector<1x128xf32>, i32 -> vector<1x128xf32>
    %c126_i32_20 = arith.constant 126 : i32
    %51 = tpu.dynamic_rotate %48 by %c126_i32_20 dim 1 : vector<1x128xf32>, i32 -> vector<1x128xf32>
    %c2_i32_21 = arith.constant 2 : i32
    %52 = tpu.dynamic_rotate %48 by %c2_i32_21 dim 1 : vector<1x128xf32>, i32 -> vector<1x128xf32>
    %53 = arith.select %20, %0, %50 : vector<1x128xi1>, vector<1x128xf32>
    %54 = arith.select %20, %49, %0 : vector<1x128xi1>, vector<1x128xf32>
    %55 = arith.select %20, %48, %52 : vector<1x128xi1>, vector<1x128xf32>
    %56 = arith.select %20, %51, %48 : vector<1x128xi1>, vector<1x128xf32>
    %57 = arith.subf %54, %53 : vector<1x128xf32>
    %cst_22 = arith.constant 0.000000e+00 : f32
    %58 = vector.broadcast %cst_22 : f32 to vector<1x128xf32>
    %59 = arith.addf %57, %58 : vector<1x128xf32>
    %cst_23 = arith.constant 0.000000e+00 : f32
    %60 = vector.broadcast %cst_23 : f32 to vector<1x128xf32>
    %61 = arith.subf %59, %60 : vector<1x128xf32>
    %cst_24 = arith.constant 5.000000e-01 : f32
    %62 = vector.broadcast %cst_24 : f32 to vector<1x128xf32>
    %63 = arith.mulf %61, %62 : vector<1x128xf32>
    %64 = arith.addf %53, %63 : vector<1x128xf32>
    %65 = arith.mulf %55, %59 : vector<1x128xf32>
    %66 = arith.addf %65, %64 : vector<1x128xf32>
    %67 = math.exp %56 : vector<1x128xf32>
    %68 = arith.mulf %67, %59 : vector<1x128xf32>
    %cst_25 = arith.constant 0.000000e+00 : f32
    %69 = vector.broadcast %cst_25 : f32 to vector<1x128xf32>
    %70 = arith.subf %68, %69 : vector<1x128xf32>
    %cst_26 = arith.constant 5.000000e-01 : f32
    %71 = vector.broadcast %cst_26 : f32 to vector<1x128xf32>
    %72 = arith.mulf %70, %71 : vector<1x128xf32>
    %73 = arith.subf %66, %72 : vector<1x128xf32>
    %74 = arith.addf %66, %72 : vector<1x128xf32>
    %75 = arith.select %20, %73, %74 : vector<1x128xi1>, vector<1x128xf32>
    %c0_27 = arith.constant 0 : index
    %c0_28 = arith.constant 0 : index
    %76 = vector.load %arg3[%c0_27, %c0_28] : memref<1x128xf32, #tpu.memory_space<vmem>>, vector<1x128xf32>
    tpu.vector_store %arg3[%c0_27, %c0_28], %75 {strides = array<i32>} : memref<1x128xf32, #tpu.memory_space<vmem>>, vector<1x128xf32>,
    return
  }
  func.func @transform_0(%arg0: i32) -> (i32, i32) {
    %c0_i32 = arith.constant 0 : i32
    %c0_i32_0 = arith.constant 0 : i32
    return %arg0, %c0_i32 : i32, i32
  }
  func.func @transform_1(%arg0: i32) -> (i32, i32) {
    %c0_i32 = arith.constant 0 : i32
    %c0_i32_0 = arith.constant 0 : i32
    return %arg0, %c0_i32 : i32, i32
  }
  func.func @transform_2(%arg0: i32) -> (i32, i32) {
    %c0_i32 = arith.constant 0 : i32
    %c0_i32_0 = arith.constant 0 : i32
    return %arg0, %c0_i32 : i32, i32
  }
}

</mosaic_0001>

<bundles_post_ra>
// kernel: tpu_custom_call.1
= control target key start
LH: loop header
LB: loop body
LE: loop exit
PB: predicated region body
PF: predicated region fallthrough
CT: control target
= control target key end

     0   :  { %7 = vsyncpa [#allocation3], 0  ;;  %s235_s0 = inlined_call_operand.hbm [shape: f32[1,128], index: 0, kind: input, shape index: {}]   ;;  %s236_s1 = inlined_call_operand.hbm [shape: f32[1,128], index: 1, kind: input, shape index: {}]   ;;  %s237_s2 = inlined_call_operand.hbm [shape: f32[1,128], index: 2, kind: output, shape index: {}]  }
   0x1   :  { %8 = vsyncpa [#allocation6], 0 }
   0x2   :  { %9 = vsyncpa [#allocation4], 0  ;;  %s15_s11 = sshll.u32 %s235_s0, 4  ;;  %s199_s12 = smov [#allocation2]   ;;  %s16_s11 = int_to_ptr.hbm [resolvable:$true] %s15_s11 }
   0x3   :  { %s17_s13 = sshll.u32 %s199_s12, 4  ;;  %s26_s16 = sshll.u32 %s236_s1, 4  ;;  %s18_s13 = int_to_ptr.vmem [resolvable:$true] %s17_s13  ;;  %s27_s16 = int_to_ptr.hbm [resolvable:$true] %s26_s16 }
   0x4   :  { %20 = dma.hbm_to_vmem [thread:$0]  %s16_s11, 16, %s18_s13, [#allocation3]  }
   0x5   :  { %s200_s17 = smov [#allocation5]  }
   0x6   :  { %s28_s18 = sshll.u32 %s200_s17, 4  ;;  %s29_s18 = int_to_ptr.vmem [resolvable:$true] %s28_s18 }
   0x7   :  { %31 = dma.hbm_to_vmem [thread:$0]  %s27_s16, 16, %s29_s18, [#allocation6]  }
   0x8   :  { %193 = dma.done.wait [#allocation3], 16  }
   0x9   :  { %194 = vsyncadd [#allocation3], 4294967280 }
   0xa   :  { %195 = dma.done.wait [#allocation6], 16  }
   0xb   :  { %196 = vsyncadd [#allocation6], 4294967280  ;;  %v42_v0 = vlaneseq  ;;  %v41_v3 = vld [vmem:[#allocation5] sm:$0x1]  ;;  %v201_v4 = vmov 1.2  }
   0xc   :  { %v202_v6 = vmov -0.05   ;;  %v40_v10 = vld [vmem:[#allocation2] sm:$0x1]  ;;  %s203_s0 = smov 2   ;;  %s204_s1 = smov 126  }
   0xd   :  { %v43_v1 = vand.u32 127, %v42_v0  ;;  %70 = vrot.lane.b32.xlu1 %v40_v10, %s203_s0  ;;  %s205_s19 = smov [#allocation7]   ;;  %s101_s23 = sshll.u32 %s237_s2, 4  ;;  %s102_s23 = int_to_ptr.hbm [resolvable:$true] %s101_s23 }
   0xe   :  { %s99_s20 = sshll.u32 %s205_s19, 4  ;;  %s100_s20 = int_to_ptr.vmem [resolvable:$true] %s99_s20 }
   0xf   :  { %v48_v2 = vand.u32 3, %v43_v1 }
  0x11   :  { %vm57_vm0 = vcmp.eq.s32.totalorder %v48_v2, 0  ;;  %vm58_vm1 = vcmp.eq.s32.totalorder %v48_v2, 1  ;;  %vm59_vm2 = vcmp.eq.s32.totalorder %v48_v2, 2  ;;  %vm56_vm3 = vcmp.lt.s32.totalorder %v48_v2, 2 }
  0x12   :  { %v60_v5 = vsel %vm59_vm2, 0.9, %v201_v4  ;;  %v64_v7 = vsel %vm59_vm2, 0.05, %v202_v6 }
  0x13   :  { %v61_v8 = vsel %vm58_vm1, 1.1, %v60_v5  ;;  %v65_v9 = vsel %vm58_vm1, -0.1, %v64_v7 }
  0x14   :  { %v62_v11 = vsel %vm57_vm0, 1.0, %v61_v8  ;;  %v66_v12 = vsel %vm57_vm0, 0.1, %v65_v9 }
  0x15   :  { %v63_v13 = vmul.f32 %v62_v11, %v41_v3 }
  0x17   :  { %v67_v14 = vadd.f32 %v66_v12, %v63_v13 }
  0x19   :  { %72 = vrot.lane.b32.xlu0 %v67_v14, %s204_s1  ;;  %74 = vrot.lane.b32.xlu1 %v67_v14, %s203_s0 }
  0x21   :  { %68 = vrot.lane.b32.xlu0 %v40_v10, %s204_s1 }
  0x7f   :  { %v71_v15 = vpop.permute.xlu1 %70 }
  0x80   :  { %v76_v21 = vsel %vm56_vm3, %v40_v10, %v71_v15 }
  0x8b   :  { %v73_v16 = vpop.permute.xlu0 %72  ;;  %v75_v20 = vpop.permute.xlu1 %74 }
  0x8c   :  { %v79_v17 = vsel %vm56_vm3, %v73_v16, %v67_v14  ;;  %v78_v25 = vsel %vm56_vm3, %v67_v14, %v75_v20 }
  0x8d   :  { %v86_v18 = vmul.f32 1.442695, %v79_v17 }
  0x8f   :  { %119 = vpow2.f32 %v86_v18 }
  0x93   :  { %v69_v19 = vpop.permute.xlu0 %68 }
  0x94   :  { %v77_v22 = vsel %vm56_vm3, %v69_v19, %v40_v10 }
  0x95   :  { %v120_v23 = vpop.eup %119  ;;  %v80_v24 = vsub.f32 %v77_v22, %v76_v21 }
  0x97   :  { %v82_v26 = vmul.f32 0.5, %v80_v24  ;;  %v88_v27 = vmul.f32 %v120_v23, %v80_v24  ;;  %v84_v29 = vmul.f32 %v80_v24, %v78_v25 }
  0x99   :  { %v83_v28 = vadd.f32 %v82_v26, %v76_v21  ;;  %v89_v30 = vmul.f32 0.5, %v88_v27 }
  0x9b   :  { %v85_v31 = vadd.f32 %v84_v29, %v83_v28 }
  0x9d   :  { %v90_v32 = vsub.f32 %v85_v31, %v89_v30  ;;  %v91_v33 = vadd.f32 %v89_v30, %v85_v31 }
  0x9f   :  { %v92_v34 = vsel %vm56_vm3, %v90_v32, %v91_v33 }
  0xa0   :  { %93 = vst [vmem:[#allocation7] sm:$0x1] %v92_v34 }
  0xa1   :  { %104 = dma.vmem_to_hbm [thread:$0]  %s100_s20, 16, %s102_s23, [#allocation4]  }
  0xa2   :  { %197 = dma.done.wait [#allocation4], 16  }
  0xa3   :  { %198 = vsyncadd [#allocation4], 4294967280 }
  0xa4   :  { %109 = vsyncpa [#allocation3], 1 }
  0xa5   :  { %110 = vsyncpa [#allocation6], 1 }
  0xa6   :  { %111 = vsyncpa [#allocation4], 1 }

</bundles_post_ra>
